<compile_context>
chip_gen: v5e
topology: v5e:2x2
jax: 0.10.0
libtpu: 0.0.40
codegen_flags: <defaults>
</compile_context>

<pallas_src>
import functools

import jax
import jax.numpy as jnp
import numpy as np
from jax.experimental import pallas as pl
from jax.experimental.pallas import tpu as pltpu


def attention_kernel(x_ref, w1t_ref, w2_ref, r_ref, att_ref, *, tbc):
    """One grid step = TB batch elements; inner loop = TBC rows per chunk.

    x_ref   : (TB, S, H) input tile (VMEM)
    w1t_ref : (H, H)     first Linear weight, pre-transposed (x @ w1t == Linear)
    w2_ref  : (1, H)     second Linear weight (its bias cancels in the softmax)
    r_ref   : (TB, H)    attention-weighted sum
    att_ref : (TB, S)    attention weights
    """
    TB, S, H = x_ref.shape

    @pl.loop(0, TB // tbc)
    def _(c):
        i = pl.multiple_of(c * tbc, tbc)
        xc = x_ref[pl.ds(i, tbc)]                                    # (tbc, S, H)

        # First Linear + Tanh: one MXU matmul over tbc*S rows, f32 accumulate.
        # (The reshape is free when S % 8 == 0; otherwise it costs a relayout.)
        h = jnp.tanh(jnp.dot(xc.reshape(tbc * S, H), w1t_ref[...],
                             preferred_element_type=jnp.float32))    # (tbc*S, H)

        # Second Linear (H -> 1) as VPU multiply + lane reduction (bias dropped).
        w2 = w2_ref[...].astype(jnp.float32)                          # (1, H)
        scores = jnp.sum(h.reshape(tbc, S, H) * w2[None, :, :], axis=-1)  # (tbc,S)

        # Softmax over the sequence axis (torch dim=1), f32.
        m = jnp.max(scores, axis=-1, keepdims=True)
        p = jnp.exp(scores - m)
        att = p / jnp.sum(p, axis=-1, keepdims=True)                  # (tbc, S)

        # r[b, :] = sum_s x[b, s, :] * att[b, s]   (VPU mul + sublane reduce).
        r = jnp.sum(xc.astype(jnp.float32) * att[:, :, None], axis=1)  # (tbc, H)

        r_ref[pl.ds(i, tbc)] = r.astype(r_ref.dtype)
        att_ref[pl.ds(i, tbc)] = att.astype(att_ref.dtype)


def _vmem_capacity_bytes():
    """Per-core VMEM capacity (128 MiB v5e/v6e, 64 MiB v7x); safe fallback."""
    try:
        cap = int(getattr(pltpu.get_tpu_info(), "vmem_capacity_bytes", 0))
        if cap > 0:
            return cap
    except Exception:
        pass
    return 64 << 20  # conservative (v7x-sized)


def _choose_tiles(B, S, H, x_itemsize, vmem_budget):
    """Pick (TB, TBC): batch rows per grid step / per in-kernel chunk."""
    b8 = ((B + 7) // 8) * 8

    # Inner chunk TBC: multiple of 8, >= 256 MXU rows and >= ~256 KiB of data
    # per chunk when affordable, but keep the f32 live intermediates
    # (~2 chunk-equivalents: cast x + tanh output) under ~4 MiB.
    tbc = 8
    while (tbc + 8 <= b8
           and (tbc * S < 256 or 2 * tbc * S * H * 4 < (1 << 19))
           and 2 * (tbc + 8) * S * H * 4 <= (4 << 20)):
        tbc += 8

    b_cap = ((B + tbc - 1) // tbc) * tbc  # no point tiling past the batch

    # Per-grid-step VMEM: Pallas double-buffers x and both outputs; weights are
    # single-buffered (pl.Buffered(1)); plus live/compiler scratch for a chunk.
    def footprint(tb):
        return (2 * tb * S * H * x_itemsize        # x tile, double-buffered
                + 2 * tb * (H + S) * x_itemsize    # r + att outputs, double-buffered
                + H * (H + 1) * 4                  # w1t + w2 (single-buffered)
                + 2 * tbc * S * H * 4              # live f32 chunk (x cast + tanh)
                + (1 << 20))                       # slack

    tb = tbc
    while tb + tbc <= b_cap and footprint(tb + tbc) <= vmem_budget:
        tb += tbc

    # Keep grid length >= 2 when there is enough work so the "parallel" batch
    # axis can be split across v7x's two TensorCores.
    if B > tbc and -(-B // tb) < 2:
        half = -(-B // 2)
        tb = max(tbc, ((half + tbc - 1) // tbc) * tbc)
    return tb, tbc


def _const_block_spec(shape):
    """Single-buffered BlockSpec for loop-invariant (weight) inputs."""
    index_map = lambda b: (0,) * len(shape)
    try:
        return pl.BlockSpec(shape, index_map, pipeline_mode=pl.Buffered(1))
    except Exception:  # older jax without pipeline_mode: default double-buffer
        return pl.BlockSpec(shape, index_map)


def attention_layer(x, w1, w2, b2=None):
    """x: (B, S, H).  w1: (H, H) torch-style (out, in).  w2: (1, H).
    b2: (1,) unused — a constant added at every sequence position cancels in
    the softmax, so it has zero effect on (r, att_w)."""
    del b2
    B, S, H = x.shape
    w1t = jnp.transpose(w1)                       # x @ w1t == x @ w1.T

    cap = _vmem_capacity_bytes()
    budget = min(int(cap * 0.60), 48 << 20)       # tiling budget (headroom kept)
    TB, TBC = _choose_tiles(B, S, H, jnp.dtype(x.dtype).itemsize, budget)
    vmem_limit = min(int(cap * 0.90), 120 << 20)  # raise scoped-VMEM default

    grid = pl.cdiv(B, TB)
    kernel = functools.partial(attention_kernel, tbc=TBC)

    r, att_w = pl.pallas_call(
        kernel,
        out_shape=(
            jax.ShapeDtypeStruct((B, H), x.dtype),
            jax.ShapeDtypeStruct((B, S), x.dtype),
        ),
        grid_spec=pltpu.PrefetchScalarGridSpec(
            num_scalar_prefetch=0,
            grid=(grid,),
            in_specs=[
                pl.BlockSpec((TB, S, H), lambda b: (b, 0, 0)),   # batched x tile
                _const_block_spec((H, H)),                        # w1t, 1 buffer
                _const_block_spec((1, H)),                        # w2,  1 buffer
            ],
            out_specs=[
                # Lane-dense 2-D slabs.  (If production S or H were < 128 these
                # become masked partial stores; a batch-on-lane layout would
                # then be faster — skipped, typical layer_size/seq >= 128.)
                pl.BlockSpec((TB, H), lambda b: (b, 0)),
                pl.BlockSpec((TB, S), lambda b: (b, 0)),
            ],
        ),
        compiler_params=pltpu.CompilerParams(
            dimension_semantics=("parallel",),
            vmem_limit_bytes=vmem_limit,
        ),
    )(x, w1t, w2)

    return r, att_w


def attention_layer_ref(x, w1, w2, b2):
    """Pure-JAX reference of the PyTorch forward (keeps the bias, to verify that
    dropping it in the kernel is exactly output-equivalent)."""
    h = jnp.tanh(jnp.einsum("bsh,oh->bso", x, w1))          # Linear(H,H,bias=False)
    wM = jnp.einsum("bsh,oh->bso", h, w2) + b2              # Linear(H,1)
    att_w = jax.nn.softmax(wM[..., 0], axis=1)              # squeeze(2), softmax dim=1
    r = jnp.sum(x * att_w[..., None], axis=1)               # (B, H)
    return r, att_w


if __name__ == "__main__":
    B, S, H = 2, 8, 32
    key = jax.random.PRNGKey(0)
    kx, k1, k2, k3 = jax.random.split(key, 4)

    x = jax.random.normal(kx, (B, S, H), dtype=jnp.float32)

    # torch-style uniform(-1/sqrt(fan_in), 1/sqrt(fan_in)) init
    bound = 1.0 / np.sqrt(H)
    w1 = jax.random.uniform(k1, (H, H), minval=-bound, maxval=bound, dtype=jnp.float32)
    w2 = jax.random.uniform(k2, (1, H), minval=-bound, maxval=bound, dtype=jnp.float32)
    b2 = jax.random.uniform(k3, (1,), minval=-bound, maxval=bound, dtype=jnp.float32)

    r_ref, att_ref = attention_layer_ref(x, w1, w2, b2)

    # f32 path: exact vs. the biased reference (bias cancels in the softmax).
    r, att_w = attention_layer(x, w1, w2, b2)
    jax.block_until_ready((r, att_w))
    assert r.shape == (B, H) and att_w.shape == (B, S)
    np.testing.assert_allclose(np.asarray(r), np.asarray(r_ref), rtol=1e-5, atol=1e-5)
    np.testing.assert_allclose(np.asarray(att_w), np.asarray(att_ref), rtol=1e-5, atol=1e-5)

    # bf16 storage path: MXU eats bf16 directly, elementwise math stays f32.
    rb, ab = attention_layer(x.astype(jnp.bfloat16), w1.astype(jnp.bfloat16),
                             w2.astype(jnp.bfloat16), b2)
    jax.block_until_ready((rb, ab))
    np.testing.assert_allclose(np.asarray(rb.astype(jnp.float32)), np.asarray(r_ref),
                               rtol=5e-2, atol=5e-2)
    np.testing.assert_allclose(np.asarray(ab.astype(jnp.float32)), np.asarray(att_ref),
                               rtol=5e-2, atol=5e-2)

    print("KERNEL_OK")
</pallas_src>

<mosaic_0001>
module attributes {stable_mosaic.version = 11 : i64} {
  func.func @attention_kernel(%arg0: i32, %arg1: memref<8x8x32xf32, #tpu.memory_space<vmem>>, %arg2: memref<32x32xf32, #tpu.memory_space<vmem>>, %arg3: memref<1x32xf32, #tpu.memory_space<vmem>>, %arg4: memref<8x32xf32, #tpu.memory_space<vmem>>, %arg5: memref<8x8xf32, #tpu.memory_space<vmem>>) attributes {dimension_semantics = [#tpu.dimension_semantics<parallel>], iteration_bounds = array<i64: 1>, scalar_prefetch = 0 : i64, scratch_operands = 0 : i64, tpu.core_type = #tpu.core_type<tc>, window_params = [{transform_indices = @transform_0, window_bounds = array<i64: 8, 8, 32>}, {pipeline_mode = #tpu.pipeline_mode<synchronous>, transform_indices = @transform_1, window_bounds = array<i64: 32, 32>}, {pipeline_mode = #tpu.pipeline_mode<synchronous>, transform_indices = @transform_2, window_bounds = array<i64: 1, 32>}, {transform_indices = @transform_3, window_bounds = array<i64: 8, 32>}, {transform_indices = @transform_4, window_bounds = array<i64: 8, 8>}]} {
    %c0_i32 = arith.constant 0 : i32
    %c1_i32 = arith.constant 1 : i32
    %0 = arith.muli %c0_i32, %c1_i32 : i32
    %c0_i32_0 = arith.constant 0 : i32
    %1 = arith.addi %c0_i32_0, %0 : i32
    %c8_i32 = arith.constant 8 : i32
    %2 = arith.muli %1, %c8_i32 : i32
    %3 = tpu.assume_multiple %2, 8 : i32
    %4 = arith.index_cast %3 : i32 to index
    %c0 = arith.constant 0 : index
    %c0_1 = arith.constant 0 : index
    %5 = vector.load %arg1[%4, %c0, %c0_1] : memref<8x8x32xf32, #tpu.memory_space<vmem>>, vector<8x8x32xf32>
    %6 = vector.shape_cast %5 : vector<8x8x32xf32> to vector<64x32xf32>
    %c0_2 = arith.constant 0 : index
    %c0_3 = arith.constant 0 : index
    %7 = vector.load %arg2[%c0_2, %c0_3] : memref<32x32xf32, #tpu.memory_space<vmem>>, vector<32x32xf32>
    %cst = arith.constant dense<0.000000e+00> : vector<64x32xf32>
    %8 = tpu.matmul %6, %7, %cst {dimension_numbers = #tpu.dot_dimension_numbers<[1], [0], [0], [1], [0, 0, 1, 1], [], []>} : vector<64x32xf32>, vector<32x32xf32>, vector<64x32xf32> -> vector<64x32xf32>
    %9 = math.tanh %8 : vector<64x32xf32>
    %c0_4 = arith.constant 0 : index
    %c0_5 = arith.constant 0 : index
    %10 = vector.load %arg3[%c0_4, %c0_5] : memref<1x32xf32, #tpu.memory_space<vmem>>, vector<1x32xf32>
    %11 = vector.shape_cast %9 : vector<64x32xf32> to vector<8x8x32xf32>
    %12 = vector.shape_cast %10 : vector<1x32xf32> to vector<1x1x32xf32>
    %13 = vector.broadcast %12 : vector<1x1x32xf32> to vector<8x8x32xf32>
    %14 = arith.mulf %11, %13 : vector<8x8x32xf32>
    %cst_6 = arith.constant dense<0.000000e+00> : vector<8x8xf32>
    %15 = vector.multi_reduction <add>, %14, %cst_6 [2] : vector<8x8x32xf32> to vector<8x8xf32>
    %cst_7 = arith.constant dense<0xFF800000> : vector<8xf32>
    %16 = vector.multi_reduction <maximumf>, %15, %cst_7 [1] : vector<8x8xf32> to vector<8xf32>
    %17 = vector.shape_cast %16 : vector<8xf32> to vector<8x1xf32>
    %18 = vector.broadcast %17 : vector<8x1xf32> to vector<8x8xf32>
    %19 = arith.subf %15, %18 : vector<8x8xf32>
    %20 = math.exp %19 : vector<8x8xf32>
    %cst_8 = arith.constant dense<0.000000e+00> : vector<8xf32>
    %21 = vector.multi_reduction <add>, %20, %cst_8 [1] : vector<8x8xf32> to vector<8xf32>
    %22 = vector.shape_cast %21 : vector<8xf32> to vector<8x1xf32>
    %23 = vector.broadcast %22 : vector<8x1xf32> to vector<8x8xf32>
    %24 = arith.divf %20, %23 : vector<8x8xf32>
    %25 = vector.shape_cast %24 : vector<8x8xf32> to vector<8x8x1xf32>
    %26 = vector.broadcast %25 : vector<8x8x1xf32> to vector<8x8x32xf32>
    %27 = arith.mulf %5, %26 : vector<8x8x32xf32>
    %cst_9 = arith.constant dense<0.000000e+00> : vector<8x32xf32>
    %28 = vector.multi_reduction <add>, %27, %cst_9 [1] : vector<8x8x32xf32> to vector<8x32xf32>
    %29 = arith.index_cast %3 : i32 to index
    %c0_10 = arith.constant 0 : index
    %30 = vector.load %arg4[%29, %c0_10] : memref<8x32xf32, #tpu.memory_space<vmem>>, vector<8x32xf32>
    tpu.vector_store %arg4[%29, %c0_10], %28 {strides = array<i32>} : memref<8x32xf32, #tpu.memory_space<vmem>>, vector<8x32xf32>,
    %31 = arith.index_cast %3 : i32 to index
    %c0_11 = arith.constant 0 : index
    %32 = vector.load %arg5[%31, %c0_11] : memref<8x8xf32, #tpu.memory_space<vmem>>, vector<8x8xf32>
    tpu.vector_store %arg5[%31, %c0_11], %24 {strides = array<i32>} : memref<8x8xf32, #tpu.memory_space<vmem>>, vector<8x8xf32>,
    %c1_i32_12 = arith.constant 1 : i32
    return
  }
  func.func @transform_0(%arg0: i32) -> (i32, i32, i32) {
    %c0_i32 = arith.constant 0 : i32
    %c0_i32_0 = arith.constant 0 : i32
    %c0_i32_1 = arith.constant 0 : i32
    return %arg0, %c0_i32, %c0_i32_0 : i32, i32, i32
  }
  func.func @transform_1(%arg0: i32) -> (i32, i32) {
    %c0_i32 = arith.constant 0 : i32
    %c0_i32_0 = arith.constant 0 : i32
    %c0_i32_1 = arith.constant 0 : i32
    return %c0_i32, %c0_i32_0 : i32, i32
  }
  func.func @transform_2(%arg0: i32) -> (i32, i32) {
    %c0_i32 = arith.constant 0 : i32
    %c0_i32_0 = arith.constant 0 : i32
    %c0_i32_1 = arith.constant 0 : i32
    return %c0_i32, %c0_i32_0 : i32, i32
  }
  func.func @transform_3(%arg0: i32) -> (i32, i32) {
    %c0_i32 = arith.constant 0 : i32
    %c0_i32_0 = arith.constant 0 : i32
    return %arg0, %c0_i32 : i32, i32
  }
  func.func @transform_4(%arg0: i32) -> (i32, i32) {
    %c0_i32 = arith.constant 0 : i32
    %c0_i32_0 = arith.constant 0 : i32
    return %arg0, %c0_i32 : i32, i32
  }
}

</mosaic_0001>

<bundles_post_ra>
// kernel: tpu_custom_call.1
= control target key start
LH: loop header
LB: loop body
LE: loop exit
PB: predicated region body
PF: predicated region fallthrough
CT: control target
= control target key end

     0   :  { %10 = vsyncpa [#allocation3], 0  ;;  %s1098_s0 = inlined_call_operand.hbm [shape: f32[2,8,32], index: 0, kind: input, shape index: {}]   ;;  %s1099_s1 = inlined_call_operand.hbm [shape: f32[32,32], index: 1, kind: input, shape index: {}]   ;;  %s1100_s2 = inlined_call_operand.vmem [shape: f32[1,32], index: 2, kind: input, shape index: {}]   ;;  %s1101_s3 = inlined_call_operand.hbm [shape: f32[2,32], index: 3, kind: output, shape index: {0}]   ;;  %s1102_s4 = inlined_call_operand.hbm [shape: f32[2,8], index: 4, kind: output, shape index: {1}]  }
   0x1   :  { %11 = vsyncpa [#allocation6], 0 }
   0x2   :  { %12 = vsyncpa [#allocation4], 0 }
   0x3   :  { %13 = vsyncpa [#allocation9], 0 }
   0x4   :  { %17 = vsyncadd [#allocation3], 768  ;;  %s18_s17 = sshll.u32 %s1098_s0, 4  ;;  %s801_s18 = smov [#allocation2]   ;;  %s19_s17 = int_to_ptr.hbm [resolvable:$true] %s18_s17 }
   0x5   :  { %s20_s19 = sshll.u32 %s801_s18, 4  ;;  %s31_s22 = sshll.u32 %s1099_s1, 4  ;;  %s21_s19 = int_to_ptr.vmem [resolvable:$true] %s20_s19  ;;  %s32_s22 = int_to_ptr.hbm [resolvable:$true] %s31_s22 }
   0x6   :  { %s802_s23 = smov 128   ;;  %s803_s24 = smov 8  }
   0x7   :  { %26 = dma.hbm_to_vmem [thread:$0]  %s19_s17, 256, %s21_s19, [#allocation3], %s802_s23, %s802_s23, %s803_s24  }
   0x8   :  { %s804_s25 = smov [#allocation5]  }
   0x9   :  { %s33_s26 = sshll.u32 %s804_s25, 4  ;;  %s34_s26 = int_to_ptr.vmem [resolvable:$true] %s33_s26 }
   0xa   :  { %39 = dma.hbm_to_vmem [thread:$0]  %s32_s22, 512, %s34_s26, [#allocation6], %s802_s23, %s802_s23, %s803_s24  }
   0xb   :  { %793 = dma.done.wait [#allocation3], 1024  }
   0xc   :  { %794 = vsyncadd [#allocation3], 4294966272 }
   0xd   :  { %795 = dma.done.wait [#allocation6], 512  }
   0xe   :  { %796 = vsyncadd [#allocation6], 4294966784  ;;  %v63_v0 = vld [vmem:[#allocation5 + $0x18] sm:$0xff]  ;;  %v62_v1 = vld [vmem:[#allocation5 + $0x10] sm:$0xff]  ;;  %vm64_vm0 = vcmask 261120   ;;  %v182_v46 = vlaneseq  ;;  %vm192_vm1 = vcmask 1041409  }
   0xf   :  { %101 = vmatpush.msra.mxu0 %v63_v0  ;;  %625 = vmatpush.msra.mxu2 %v63_v0  ;;  %v61_v2 = vld [vmem:[#allocation5 + $0x8] sm:$0xff]  ;;  %v60_v3 = vld [vmem:[#allocation5] sm:$0xff]  ;;  %v845_v6 = vld [vmem:[#allocation2 + $0x10] sm:$0xff]  ;;  %vm194_vm2 = vcmask 1042434   ;;  %vm196_vm3 = vcmask 1043459   ;;  %vm198_vm4 = vcmask 1044484  }
  0x10   :  { %624 = vmatpush.msra.mxu1 %v63_v0  ;;  %626 = vmatpush.msra.mxu3 %v63_v0  ;;  %v841_v4 = vld [vmem:[#allocation2] sm:$0xff]  ;;  %v849_v7 = vld [vmem:[#allocation2 + $0x30] sm:$0xff]  ;;  %v857_v8 = vld [vmem:[#allocation2 + $0x8] sm:$0xff]  ;;  %v884_v48 = vand.u32 127, %v182_v46  ;;  %vm200_vm5 = vcmask 1045509   ;;  %vm1105_vm6 = vcmask 1046534  }
  0x11   :  { %102 = vmatpush.msra.mxu0 %v62_v1  ;;  %628 = vmatpush.msra.mxu2 %v62_v1  ;;  %v843_v5 = vld [vmem:[#allocation2 + $0x20] sm:$0xff]  ;;  %v859_v9 = vld [vmem:[#allocation2 + $0x28] sm:$0xff]  ;;  %v861_v10 = vld [vmem:[#allocation2 + $0x18] sm:$0xff]  ;;  %vm1104_vm7 = vcmask 1047559   ;;  %vm1103_vm8 = vcmask 64512  }
  0x12   :  { %627 = vmatpush.msra.mxu1 %v62_v1  ;;  %629 = vmatpush.msra.mxu3 %v62_v1  ;;  %v865_v11 = vld [vmem:[#allocation2 + $0x38] sm:$0xff]  ;;  %v648_v14 = vld [vmem:[%s1100_s2] ss:$0 sm:$0xff] }
  0x13   :  { %103 = vmatpush.msra.mxu0 %v61_v2  ;;  %631 = vmatpush.msra.mxu2 %v61_v2 }
  0x14   :  { %630 = vmatpush.msra.mxu1 %v61_v2  ;;  %632 = vmatpush.msra.mxu3 %v61_v2 }
  0x15   :  { %104 = vmatpush.msra.mxu0 %v60_v3  ;;  %634 = vmatpush.msra.mxu2 %v60_v3 }
  0x16   :  { %633 = vmatpush.msra.mxu1 %v60_v3  ;;  %616 = vmatmul.msk.f32.vlgmr.msra.gmra.mxu0 %vm64_vm0, %v841_v4 }
  0x17   :  { %620 = vmatmul.msk.f32.vlgmr.msra.gmra.mxu2 %vm64_vm0, %v843_v5  ;;  %618 = vmatmul.msk.f32.vlgmr.msra.gmra.mxu1 %vm64_vm0, %v845_v6 }
  0x18   :  { %635 = vmatpush.msra.mxu3 %v60_v3 }
  0x19   :  { %622 = vmatmul.msk.f32.vlgmr.msra.gmra.mxu3 %vm64_vm0, %v849_v7 }
  0x1e   :  { %617 = vmatmul.msk.f32.gmra.mxu0 %vm64_vm0, %v857_v8 }
  0x1f   :  { %621 = vmatmul.msk.f32.gmra.mxu2 %vm64_vm0, %v859_v9  ;;  %619 = vmatmul.msk.f32.gmra.mxu1 %vm64_vm0, %v861_v10 }
  0x21   :  { %623 = vmatmul.msk.f32.gmra.mxu3 %vm64_vm0, %v865_v11 }
  0x93   :  { %v106_v12 = vpop.f32.mrf.mxu0 }
  0x94   :  { %649 = vtanh.f32 %v106_v12  ;;  %v112_v13 = vpop.f32.mrf.mxu1 }
  0x95   :  { %651 = vtanh.f32 %v112_v13 }
  0x9a   :  { %v650_v15 = vpop.eup %649  ;;  %v118_v16 = vpop.f32.mrf.mxu2 }
  0x9b   :  { %v652_v17 = vpop.eup %651  ;;  %653 = vtanh.f32 %v118_v16  ;;  %v109_v18 = vpop.f32.mrf.mxu0  ;;  %v142_v19 = vmul.f32 %v650_v15, %v648_v14  ;;  %v805_v15 = vmov 0  }
  0x9c   :  { %655 = vtanh.f32 %v109_v18  ;;  %v115_v20 = vpop.f32.mrf.mxu1  ;;  %v124_v21 = vpop.f32.mrf.mxu3  ;;  %v144_v22 = vmul.f32 %v652_v17, %v648_v14  ;;  %647 = vset.pattern.permute.xlu2 %v805_v15  ;;  %646 = vset.pattern.permute.xlu1 %v805_v15 }
  0x9d   :  { %657 = vtanh.f32 %v115_v20  ;;  %v150_v23 = vsel %vm64_vm0, %v142_v19, 0.0  ;;  %645 = vset.pattern.permute.xlu0 %v805_v15 }
  0x9e   :  { %151 = vadd.xlane.f32.xlu0 %v150_v23  ;;  %v156_v24 = vsel %vm64_vm0, %v144_v22, 0.0  ;;  %659 = vtanh.f32 %v124_v21 }
  0x9f   :  { %157 = vadd.xlane.f32.xlu1 %v156_v24 }
  0xa1   :  { %v654_v25 = vpop.eup %653 }
  0xa2   :  { %v656_v26 = vpop.eup %655  ;;  %v121_v27 = vpop.f32.mrf.mxu2  ;;  %v146_v28 = vmul.f32 %v654_v25, %v648_v14 }
  0xa3   :  { %v658_v29 = vpop.eup %657  ;;  %661 = vtanh.f32 %v121_v27  ;;  %v143_v30 = vmul.f32 %v656_v26, %v648_v14 }
  0xa4   :  { %v127_v31 = vpop.f32.mrf.mxu3  ;;  %v162_v32 = vsel %vm64_vm0, %v146_v28, 0.0  ;;  %v145_v33 = vmul.f32 %v658_v29, %v648_v14  ;;  %v660_v35 = vpop.eup %659 }
  0xa5   :  { %663 = vtanh.f32 %v127_v31  ;;  %163 = vadd.xlane.f32.xlu2 %v162_v32  ;;  %v153_v34 = vsel %vm64_vm0, %v143_v30, 0.0  ;;  %v148_v38 = vmul.f32 %v660_v35, %v648_v14 }
  0xa6   :  { %154 = vadd.xlane.f32.xlu0 %v153_v34  ;;  %v159_v36 = vsel %vm64_vm0, %v145_v33, 0.0 }
  0xa7   :  { %160 = vadd.xlane.f32.xlu1 %v159_v36  ;;  %v168_v43 = vsel %vm64_vm0, %v148_v38, 0.0 }
  0xa9   :  { %v662_v37 = vpop.eup %661 }
  0xaa   :  { %v147_v39 = vmul.f32 %v662_v37, %v648_v14 }
  0xab   :  { %v664_v40 = vpop.eup %663 }
  0xac   :  { %v165_v41 = vsel %vm64_vm0, %v147_v39, 0.0  ;;  %v149_v42 = vmul.f32 %v664_v40, %v648_v14 }
  0xad   :  { %166 = vadd.xlane.f32.xlu2 %v165_v41 }
  0xae   :  { %169 = vadd.xlane.f32.xlu0 %v168_v43  ;;  %v171_v44 = vsel %vm64_vm0, %v149_v42, 0.0 }
  0xaf   :  { %172 = vadd.xlane.f32.xlu1 %v171_v44 }
 0x111   :  { %v152_v45 = vpop.xlane.xlu0 %151 }
 0x112   :  { %v158_v47 = vpop.xlane.xlu1 %157  ;;  %v184_v51 = vperm.slane %v152_v45, %v884_v48 }
 0x113   :  { %v186_v54 = vperm.slane %v158_v47, %v884_v48 }
 0x118   :  { %v164_v49 = vpop.xlane.xlu2 %163 }
 0x119   :  { %v155_v50 = vpop.xlane.xlu0 %154  ;;  %v188_v59 = vperm.slane %v164_v49, %v884_v48 }
 0x11a   :  { %v185_v52 = vperm.slane %v155_v50, %v884_v48  ;;  %v161_v53 = vpop.xlane.xlu1 %160 }
 0x11b   :  { %v187_v55 = vperm.slane %v161_v53, %v884_v48 }
 0x11c   :  { %v193_v56 = vsel %vm192_vm1, %v185_v52, %v184_v51 }
 0x11d   :  { %v195_v57 = vsel %vm194_vm2, %v186_v54, %v193_v56 }
 0x11e   :  { %v197_v58 = vsel %vm196_vm3, %v187_v55, %v195_v57 }
 0x11f   :  { %v199_v1 = vsel %vm198_vm4, %v188_v59, %v197_v58 }
 0x120   :  { %v167_v60 = vpop.xlane.xlu2 %166 }
 0x121   :  { %v189_v61 = vperm.slane %v167_v60, %v884_v48  ;;  %v170_v62 = vpop.xlane.xlu0 %169 }
 0x122   :  { %v190_v63 = vperm.slane %v170_v62, %v884_v48  ;;  %v173_v0 = vpop.xlane.xlu1 %172 }
 0x123   :  { %v191_v2 = vperm.slane %v173_v0, %v884_v48  ;;  %v201_v3 = vsel %vm200_vm5, %v189_v61, %v199_v1 }
 0x124   :  { %v203_v12 = vsel %vm1105_vm6, %v190_v63, %v201_v3 }
 0x125   :  { %v205_v13 = vsel %vm1104_vm7, %v191_v2, %v203_v12 }
 0x126   :  { %v208_v14 = vsel %vm1103_vm8, %v205_v13, -inf }
 0x127   :  { %209 = vmax.xlane.f32.xlu2 %v208_v14 }
 0x19a   :  { %v210_v16 = vpop.xlane.xlu2 %209 }
 0x19b   :  { %v214_v17 = vperm.slane %v210_v16, 2  ;;  %v213_v18 = vperm.slane %v210_v16, 1  ;;  %v212_v19 = vperm.slane %v210_v16, 0  ;;  %v215_v23 = vperm.slane %v210_v16, 3 }
 0x19c   :  { %v216_v24 = vperm.slane %v210_v16, 4  ;;  %v219_v25 = vperm.slane %v210_v16, 7  ;;  %v217_v33 = vperm.slane %v210_v16, 5  ;;  %v218_v35 = vperm.slane %v210_v16, 6 }
 0x19d   :  { %v230_v20 = vsub.f32 %v158_v47, %v214_v17  ;;  %v229_v21 = vsub.f32 %v155_v50, %v213_v18  ;;  %v228_v22 = vsub.f32 %v152_v45, %v212_v19  ;;  %v231_v29 = vsub.f32 %v161_v53, %v215_v23 }
 0x19e   :  { %v232_v30 = vsub.f32 %v164_v49, %v216_v24  ;;  %v235_v31 = vsub.f32 %v173_v0, %v219_v25  ;;  %v233_v40 = vsub.f32 %v167_v60, %v217_v33  ;;  %v234_v41 = vsub.f32 %v170_v62, %v218_v35 }
 0x19f   :  { %v240_v26 = vmul.f32 1.442695, %v230_v20  ;;  %v238_v27 = vmul.f32 1.442695, %v229_v21  ;;  %v236_v28 = vmul.f32 1.442695, %v228_v22 }
 0x1a0   :  { %v242_v32 = vmul.f32 1.442695, %v231_v29  ;;  %v244_v34 = vmul.f32 1.442695, %v232_v30  ;;  %v250_v37 = vmul.f32 1.442695, %v235_v31 }
 0x1a1   :  { %665 = vpow2.f32 %v240_v26  ;;  %v246_v42 = vmul.f32 1.442695, %v233_v40  ;;  %v248_v43 = vmul.f32 1.442695, %v234_v41 }
 0x1a2   :  { %667 = vpow2.f32 %v238_v27 }
 0x1a3   :  { %669 = vpow2.f32 %v236_v28 }
 0x1a4   :  { %671 = vpow2.f32 %v242_v32 }
 0x1a5   :  { %673 = vpow2.f32 %v244_v34 }
 0x1a6   :  { %675 = vpow2.f32 %v250_v37 }
 0x1a7   :  { %v902_v36 = vpop.eup %665  ;;  %677 = vpow2.f32 %v246_v42 }
 0x1a8   :  { %v904_v38 = vpop.eup %667  ;;  %267 = vperm.xlu2 %647, %v902_v36   ;;  %679 = vpow2.f32 %v248_v43 }
 0x1a9   :  { %v907_v39 = vpop.eup %669  ;;  %264 = vperm.xlu1 %646, %v904_v38  }
 0x1aa   :  { %261 = vperm.xlu0 %645, %v907_v39   ;;  %v911_v44 = vpop.eup %671 }
 0x1ab   :  { %v913_v45 = vpop.eup %673 }
 0x1ac   :  { %v916_v46 = vpop.eup %675 }
 0x1ad   :  { %v920_v47 = vpop.eup %677 }
 0x1ae   :  { %v922_v49 = vpop.eup %679 }
 0x1b0   :  { %270 = vperm.xlu2 %647, %v911_v44  }
 0x1b1   :  { %273 = vperm.xlu1 %646, %v913_v45  }
 0x1b2   :  { %282 = vperm.xlu0 %645, %v916_v46  }
 0x1b8   :  { %276 = vperm.xlu2 %647, %v920_v47  }
 0x1b9   :  { %279 = vperm.xlu1 %646, %v922_v49  }
 0x202   :  { %v268_v50 = vpop.permute.xlu2 %267 }
 0x203   :  { %v286_v58 = vperm.slane %v268_v50, %v884_v48 }
 0x20a   :  { %v271_v53 = vpop.permute.xlu2 %270 }
 0x20b   :  { %v287_v61 = vperm.slane %v271_v53, %v884_v48 }
 0x212   :  { %v277_v62 = vpop.permute.xlu2 %276 }
 0x213   :  { %v289_v2 = vperm.slane %v277_v62, %v884_v48 }
 0x21b   :  { %v265_v51 = vpop.permute.xlu1 %264 }
 0x21c   :  { %v262_v52 = vpop.permute.xlu0 %261  ;;  %v285_v54 = vperm.slane %v265_v51, %v884_v48 }
 0x21d   :  { %v284_v55 = vperm.slane %v262_v52, %v884_v48 }
 0x21f   :  { %v292_v56 = vsel %vm192_vm1, %v285_v54, %v284_v55 }
 0x220   :  { %v293_v59 = vsel %vm194_vm2, %v286_v58, %v292_v56 }
 0x221   :  { %v294_v63 = vsel %vm196_vm3, %v287_v61, %v293_v59 }
 0x223   :  { %v274_v57 = vpop.permute.xlu1 %273 }
 0x224   :  { %v288_v60 = vperm.slane %v274_v57, %v884_v48  ;;  %v283_v1 = vpop.permute.xlu0 %282 }
 0x225   :  { %v291_v13 = vperm.slane %v283_v1, %v884_v48 }
 0x226   :  { %v295_v0 = vsel %vm198_vm4, %v288_v60, %v294_v63 }
 0x227   :  { %v296_v14 = vsel %vm200_vm5, %v289_v2, %v295_v0 }
 0x22b   :  { %v280_v3 = vpop.permute.xlu1 %279 }
 0x22c   :  { %v290_v12 = vperm.slane %v280_v3, %v884_v48 }
 0x22e   :  { %v297_v15 = vsel %vm1105_vm6, %v290_v12, %v296_v14 }
 0x22f   :  { %v298_v16 = vsel %vm1104_vm7, %v291_v13, %v297_v15 }
 0x230   :  { %v300_v17 = vsel %vm1103_vm8, %v298_v16, 0.0 }
 0x231   :  { %301 = vadd.xlane.f32.xlu2 %v300_v17 }
 0x2a4   :  { %v302_v18 = vpop.xlane.xlu2 %301 }
 0x2a5   :  { %v304_v19 = vperm.slane %v302_v18, 0  ;;  %v305_v20 = vperm.slane %v302_v18, 1  ;;  %v942_v21 = vperm.slane %v302_v18, 2  ;;  %v944_v22 = vperm.slane %v302_v18, 3 }
 0x2a6   :  { %v946_v23 = vperm.slane %v302_v18, 4  ;;  %v948_v24 = vperm.slane %v302_v18, 5  ;;  %v954_v29 = vperm.slane %v302_v18, 7  ;;  %v956_v32 = vperm.slane %v302_v18, 6 }
 0x2a7   :  { %681 = vrcp.f32 %v304_v19  ;;  %v344_v25 = vand.u32 2147483647, %v305_v20  ;;  %v346_v26 = vand.u32 2147483648, %v305_v20  ;;  %v329_v27 = vand.u32 2147483647, %v304_v19 }
 0x2a8   :  { %683 = vrcp.f32 %v305_v20  ;;  %v331_v30 = vand.u32 2147483648, %v304_v19  ;;  %vm340_vm9 = vweird.f32 %v305_v20  ;;  %vm325_vm11 = vweird.f32 %v304_v19 }
 0x2a9   :  { %685 = vrcp.f32 %v942_v21  ;;  %vm960_vm10 = vcmp.eq.f32.partialorder %v344_v25, 8.507059e+37  ;;  %v347_v41 = vor.u32 1.1754944e-38, %v346_v26  ;;  %vm966_vm12 = vcmp.eq.f32.partialorder %v329_v27, 8.507059e+37 }
 0x2aa   :  { %687 = vrcp.f32 %v944_v22  ;;  %v332_v53 = vor.u32 1.1754944e-38, %v331_v30  ;;  %v376_v63 = vand.u32 2147483648, %v944_v22  ;;  %v361_v1 = vand.u32 2147483648, %v942_v21 }
 0x2ab   :  { %689 = vrcp.f32 %v946_v23  ;;  %v359_v26 = vand.u32 2147483647, %v942_v21 }
 0x2ac   :  { %691 = vrcp.f32 %v948_v24 }
 0x2ad   :  { %v682_v28 = vpop.eup %681  ;;  %693 = vrcp.f32 %v954_v29 }
 0x2ae   :  { %v684_v31 = vpop.eup %683  ;;  %v321_v33 = vmul.f32 %v682_v28, %v304_v19  ;;  %vm326_vm13 = vweird.f32 %v682_v28  ;;  %695 = vrcp.f32 %v956_v32 }
 0x2af   :  { %v958_v34 = vpop.eup %685  ;;  %v336_v35 = vmul.f32 %v684_v31, %v305_v20  ;;  %vm341_vm14 = vweird.f32 %v684_v31  ;;  %vm327_vm15 = vmor %vm325_vm11, %vm326_vm13  ;;  %vm370_vm11 = vweird.f32 %v944_v22 }
 0x2b0   :  { %v964_v40 = vpop.eup %687  ;;  %v322_v42 = vsub.f32 1.0, %v321_v33  ;;  %v351_v50 = vmul.f32 %v958_v34, %v942_v21  ;;  %vm356_vm8 = vweird.f32 %v958_v34  ;;  %vm342_vm7 = vmor %vm340_vm9, %vm341_vm14  ;;  %vm355_vm9 = vweird.f32 %v942_v21 }
 0x2b1   :  { %v972_v51 = vpop.eup %689  ;;  %v337_v52 = vsub.f32 1.0, %v336_v35  ;;  %v366_v54 = vmul.f32 %v964_v40, %v944_v22  ;;  %vm371_vm6 = vweird.f32 %v964_v40  ;;  %v362_v21 = vor.u32 1.1754944e-38, %v361_v1 }
 0x2b2   :  { %v977_v55 = vpop.eup %691  ;;  %v323_v56 = vmul.f32 %v682_v28, %v322_v42  ;;  %v352_v57 = vsub.f32 1.0, %v351_v50  ;;  %v381_v58 = vmul.f32 %v972_v51, %v946_v23  ;;  %v377_v35 = vor.u32 1.1754944e-38, %v376_v63 }
 0x2b3   :  { %v338_v59 = vmul.f32 %v684_v31, %v337_v52  ;;  %v367_v60 = vsub.f32 1.0, %v366_v54  ;;  %v396_v61 = vmul.f32 %v977_v55, %v948_v24  ;;  %v993_v15 = vpop.eup %693  ;;  %vm401_vm13 = vweird.f32 %v977_v55 }
 0x2b4   :  { %v324_v62 = vadd.f32 %v682_v28, %v323_v56  ;;  %v353_v0 = vmul.f32 %v958_v34, %v352_v57  ;;  %v382_v14 = vsub.f32 1.0, %v381_v58  ;;  %v391_v50 = vand.u32 2147483648, %v946_v23 }
 0x2b5   :  { %v339_v2 = vadd.f32 %v684_v31, %v338_v59  ;;  %v368_v3 = vmul.f32 %v964_v40, %v367_v60  ;;  %v397_v19 = vsub.f32 1.0, %v396_v61  ;;  %vm385_vm14 = vweird.f32 %v946_v23 }
 0x2b6   :  { %v328_v12 = vsel %vm327_vm15, %v682_v28, %v324_v62  ;;  %v354_v13 = vadd.f32 %v958_v34, %v353_v0  ;;  %v374_v28 = vand.u32 2147483647, %v944_v22  ;;  %v426_v22 = vmul.f32 %v993_v15, %v954_v29 }
 0x2b7   :  { %v343_v16 = vsel %vm342_vm7, %v684_v31, %v339_v2  ;;  %v333_v17 = vsel %vm966_vm12, %v332_v53, %v328_v12  ;;  %v369_v18 = vadd.f32 %v964_v40, %v368_v3  ;;  %vm357_vm7 = vmor %vm355_vm9, %vm356_vm8  ;;  %v1012_v31 = vpop.eup %695  ;;  %v398_v33 = vmul.f32 %v977_v55, %v397_v19 }
 0x2b8   :  { %v348_v25 = vsel %vm960_vm10, %v347_v41, %v343_v16  ;;  %v334_v20 = vmul.f32 %v907_v39, %v333_v17  ;;  %vm372_vm12 = vmor %vm370_vm11, %vm371_vm6  ;;  %v358_v30 = vsel %vm357_vm7, %v958_v34, %v354_v13  ;;  %v383_v39 = vmul.f32 %v972_v51, %v382_v14 }
 0x2b9   :  { %v349_v27 = vmul.f32 %v904_v38, %v348_v25  ;;  %v373_v38 = vsel %vm372_vm12, %v964_v40, %v369_v18  ;;  %vm360_vm8 = vcmp.eq.f32.partialorder %v359_v26, 8.507059e+37  ;;  %vm375_vm10 = vcmp.eq.f32.partialorder %v374_v28, 8.507059e+37 }
 0x2ba   :  { %442 = vperm.xlu1 %646, %v334_v20   ;;  %v363_v37 = vsel %vm360_vm8, %v362_v21, %v358_v30  ;;  %v406_v41 = vand.u32 2147483648, %v948_v24  ;;  %v378_v34 = vsel %vm375_vm10, %v377_v35, %v373_v38  ;;  %v384_v42 = vadd.f32 %v972_v51, %v383_v39 }
 0x2bb   :  { %447 = vperm.xlu0 %645, %v349_v27   ;;  %vm386_vm6 = vweird.f32 %v972_v51  ;;  %v411_v40 = vmul.f32 %v1012_v31, %v956_v32  ;;  %v399_v43 = vadd.f32 %v977_v55, %v398_v33  ;;  %v427_v52 = vsub.f32 1.0, %v426_v22 }
 0x2bc   :  { %v364_v53 = vmul.f32 %v902_v36, %v363_v37  ;;  %v389_v54 = vand.u32 2147483647, %v946_v23  ;;  %v379_v57 = vmul.f32 %v911_v44, %v378_v34  ;;  %vm400_vm15 = vweird.f32 %v948_v24  ;;  %vm387_vm9 = vmor %vm385_vm14, %vm386_vm6 }
 0x2bd   :  { %v412_v56 = vsub.f32 1.0, %v411_v40  ;;  %v404_v58 = vand.u32 2147483647, %v948_v24  ;;  %vm402_vm11 = vmor %vm400_vm15, %vm401_vm13  ;;  %v388_v59 = vsel %vm387_vm9, %v972_v51, %v384_v42  ;;  %v392_v61 = vor.u32 1.1754944e-38, %v391_v50 }
 0x2be   :  { %v403_v36 = vsel %vm402_vm11, %v977_v55, %v399_v43  ;;  %v428_v23 = vmul.f32 %v993_v15, %v427_v52  ;;  %v407_v62 = vor.u32 1.1754944e-38, %v406_v41  ;;  %vm390_vm7 = vcmp.eq.f32.partialorder %v389_v54, 8.507059e+37 }
 0x2bf   :  { %v413_v60 = vmul.f32 %v1012_v31, %v412_v56  ;;  %vm405_vm12 = vcmp.eq.f32.partialorder %v404_v58, 8.507059e+37  ;;  %v393_v44 = vsel %vm390_vm7, %v392_v61, %v388_v59  ;;  %vm416_vm8 = vweird.f32 %v1012_v31 }
 0x2c0   :  { %v408_v63 = vsel %vm405_vm12, %v407_v62, %v403_v36  ;;  %v429_v0 = vadd.f32 %v993_v15, %v428_v23  ;;  %vm431_vm10 = vweird.f32 %v993_v15  ;;  %v421_v51 = vand.u32 2147483648, %v956_v32 }
 0x2c1   :  { %v414_v24 = vadd.f32 %v1012_v31, %v413_v60  ;;  %v394_v55 = vmul.f32 %v913_v45, %v393_v44  ;;  %v436_v1 = vand.u32 2147483648, %v954_v29  ;;  %vm415_vm6 = vweird.f32 %v956_v32 }
 0x2c2   :  { %452 = vperm.xlu1 %646, %v364_v53   ;;  %v419_v2 = vand.u32 2147483647, %v956_v32  ;;  %v409_v3 = vmul.f32 %v920_v47, %v408_v63  ;;  %vm430_vm13 = vweird.f32 %v954_v29  ;;  %v434_v12 = vand.u32 2147483647, %v954_v29  ;;  %vm417_vm14 = vmor %vm415_vm6, %vm416_vm8 }
 0x2c3   :  { %457 = vperm.xlu0 %645, %v379_v57   ;;  %vm432_vm15 = vmor %vm430_vm13, %vm431_vm10  ;;  %v418_v13 = vsel %vm417_vm14, %v1012_v31, %v414_v24  ;;  %v422_v14 = vor.u32 1.1754944e-38, %v421_v51  ;;  %v437_v16 = vor.u32 1.1754944e-38, %v436_v1  ;;  %vm1110_vm7 = vcmask 1046534  }
 0x2c4   :  { %v433_v45 = vsel %vm432_vm15, %v993_v15, %v429_v0  ;;  %vm420_vm9 = vcmp.eq.f32.partialorder %v419_v2, 8.507059e+37  ;;  %vm435_vm11 = vcmp.eq.f32.partialorder %v434_v12, 8.507059e+37  ;;  %vm1111_vm12 = vcmask 1047559  }
 0x2c5   :  { %v423_v17 = vsel %vm420_vm9, %v422_v14, %v418_v13  ;;  %v438_v32 = vsel %vm435_vm11, %v437_v16, %v433_v45  ;;  %vm1112_vm8 = vcmask 64512   ;;  %vm1114_vm10 = vmmov %vm1111_vm12 }
 0x2c6   :  { %v424_v47 = vmul.f32 %v922_v49, %v423_v17  ;;  %v439_v18 = vmul.f32 %v916_v46, %v438_v32 }
 0x2ca   :  { %462 = vperm.xlu1 %646, %v394_v55  }
 0x2cb   :  { %467 = vperm.xlu0 %645, %v409_v3  }
 0x2d2   :  { %472 = vperm.xlu1 %646, %v424_v47  }
 0x2d3   :  { %477 = vperm.xlu0 %645, %v439_v18  }
 0x32c   :  { %v443_v29 = vpop.permute.xlu1 %442 }
 0x32d   :  { %v448_v19 = vpop.permute.xlu0 %447  ;;  %v480_v25 = vmul.f32 %v443_v29, %v841_v4  ;;  %v561_v37 = vperm.slane %v443_v29, %v884_v48 }
 0x32e   :  { %v481_v20 = vmul.f32 %v448_v19, %v857_v8  ;;  %v562_v35 = vperm.slane %v448_v19, %v884_v48 }
 0x32f   :  { %v488_v15 = vsel %vm64_vm0, %v480_v25, 0.0 }
 0x330   :  { %v495_v26 = vsel %vm64_vm0, %v481_v20, 0.0  ;;  %v489_v27 = vrot.slane %v488_v15, 4  ;;  %v569_v52 = vsel %vm192_vm1, %v562_v35, %v561_v37 }
 0x331   :  { %v496_v28 = vrot.slane %v495_v26, 4 }
 0x332   :  { %v490_v39 = vadd.f32 %v489_v27, %v488_v15 }
 0x333   :  { %v497_v30 = vadd.f32 %v496_v28, %v495_v26 }
 0x334   :  { %v453_v31 = vpop.permute.xlu1 %452  ;;  %v491_v4 = vrot.slane %v490_v39, 2 }
 0x335   :  { %v458_v49 = vpop.permute.xlu0 %457  ;;  %v482_v46 = vmul.f32 %v453_v31, %v845_v6  ;;  %v498_v33 = vrot.slane %v497_v30, 2  ;;  %v563_v42 = vperm.slane %v453_v31, %v884_v48 }
 0x336   :  { %v483_v38 = vmul.f32 %v458_v49, %v861_v10  ;;  %v492_v6 = vadd.f32 %v491_v4, %v490_v39  ;;  %v564_v53 = vperm.slane %v458_v49, %v884_v48 }
 0x337   :  { %v502_v21 = vsel %vm64_vm0, %v482_v46, 0.0  ;;  %v499_v43 = vadd.f32 %v498_v33, %v497_v30  ;;  %v570_v58 = vsel %vm194_vm2, %v563_v42, %v569_v52 }
 0x338   :  { %v509_v8 = vsel %vm64_vm0, %v483_v38, 0.0  ;;  %v503_v22 = vrot.slane %v502_v21, 4  ;;  %v493_v62 = vrot.slane %v492_v6, 1 }
 0x339   :  { %v510_v41 = vrot.slane %v509_v8, 4  ;;  %v500_v23 = vrot.slane %v499_v43, 1 }
 0x33a   :  { %v504_v34 = vadd.f32 %v503_v22, %v502_v21  ;;  %v494_v12 = vadd.f32 %v493_v62, %v492_v6 }
 0x33b   :  { %v511_v40 = vadd.f32 %v510_v41, %v509_v8  ;;  %v501_v3 = vadd.f32 %v500_v23, %v499_v43 }
 0x33c   :  { %v505_v50 = vrot.slane %v504_v34, 2  ;;  %v463_v10 = vpop.permute.xlu1 %462 }
 0x33d   :  { %v468_v54 = vpop.permute.xlu0 %467  ;;  %v484_v56 = vmul.f32 %v463_v10, %v843_v5  ;;  %v512_v57 = vrot.slane %v511_v40, 2  ;;  %v565_v60 = vperm.slane %v463_v10, %v884_v48  ;;  %v571_v5 = vsel %vm196_vm3, %v564_v53, %v570_v58 }
 0x33e   :  { %v485_v59 = vmul.f32 %v468_v54, %v859_v9  ;;  %v506_v36 = vadd.f32 %v505_v50, %v504_v34  ;;  %v566_v0 = vperm.slane %v468_v54, %v884_v48 }
 0x33f   :  { %v516_v61 = vsel %vm64_vm0, %v484_v56, 0.0  ;;  %v513_v51 = vadd.f32 %v512_v57, %v511_v40  ;;  %v572_v1 = vsel %vm198_vm4, %v565_v60, %v571_v5 }
 0x340   :  { %v523_v44 = vsel %vm64_vm0, %v485_v59, 0.0  ;;  %v517_v63 = vrot.slane %v516_v61, 4  ;;  %v507_v9 = vrot.slane %v506_v36, 1  ;;  %v573_v17 = vsel %vm200_vm5, %v566_v0, %v572_v1 }
 0x341   :  { %v524_v24 = vrot.slane %v523_v44, 4  ;;  %v514_v18 = vrot.slane %v513_v51, 1 }
 0x342   :  { %v518_v55 = vadd.f32 %v517_v63, %v516_v61  ;;  %v508_v20 = vadd.f32 %v507_v9, %v506_v36 }
 0x343   :  { %v525_v2 = vadd.f32 %v524_v24, %v523_v44  ;;  %v515_v46 = vadd.f32 %v514_v18, %v513_v51 }
 0x344   :  { %v519_v13 = vrot.slane %v518_v55, 2  ;;  %v473_v45 = vpop.permute.xlu1 %472 }
 0x345   :  { %v526_v14 = vrot.slane %v525_v2, 2  ;;  %v478_v16 = vpop.permute.xlu0 %477  ;;  %v486_v32 = vmul.f32 %v473_v45, %v849_v7  ;;  %v567_v47 = vperm.slane %v473_v45, %v884_v48 }
 0x346   :  { %v520_v29 = vadd.f32 %v519_v13, %v518_v55  ;;  %v487_v19 = vmul.f32 %v478_v16, %v865_v11  ;;  %v568_v25 = vperm.slane %v478_v16, %v884_v48  ;;  %v552_v11 = vsel %vm192_vm1, %v501_v3, %v494_v12  ;;  %vm1113_vm1 = vmmov %vm1110_vm7 }
 0x347   :  { %v527_v15 = vadd.f32 %v526_v14, %v525_v2  ;;  %v530_v26 = vsel %vm64_vm0, %v486_v32, 0.0  ;;  %v574_v27 = vsel %vm1110_vm7, %v567_v47, %v573_v17  ;;  %v553_v21 = vsel %vm194_vm2, %v508_v20, %v552_v11 }
 0x348   :  { %v521_v28 = vrot.slane %v520_v29, 1  ;;  %v537_v30 = vsel %vm64_vm0, %v487_v19, 0.0  ;;  %v531_v39 = vrot.slane %v530_v26, 4  ;;  %v575_v7 = vsel %vm1111_vm12, %v568_v25, %v574_v27 }
 0x349   :  { %v538_v31 = vrot.slane %v537_v30, 4  ;;  %577 = vst.msk [vmem:[#allocation8] sm:$0xff] %vm1112_vm8, %v575_v7  ;;  %v528_v48 = vrot.slane %v527_v15, 1  ;;  %v554_v37 = vsel %vm196_vm3, %v515_v46, %v553_v21 }
 0x34a   :  { %v532_v49 = vadd.f32 %v531_v39, %v530_v26  ;;  %v522_v33 = vadd.f32 %v521_v28, %v520_v29 }
 0x34b   :  { %v539_v38 = vadd.f32 %v538_v31, %v537_v30  ;;  %v529_v35 = vadd.f32 %v528_v48, %v527_v15 }
 0x34c   :  { %v533_v4 = vrot.slane %v532_v49, 2  ;;  %v555_v34 = vsel %vm198_vm4, %v522_v33, %v554_v37 }
 0x34d   :  { %v540_v8 = vrot.slane %v539_v38, 2  ;;  %v556_v50 = vsel %vm200_vm5, %v529_v35, %v555_v34 }
 0x34e   :  { %v534_v22 = vadd.f32 %v533_v4, %v532_v49 }
 0x34f   :  { %v541_v41 = vadd.f32 %v540_v8, %v539_v38 }
 0x350   :  { %v535_v42 = vrot.slane %v534_v22, 1 }
 0x351   :  { %v542_v40 = vrot.slane %v541_v41, 1 }
 0x352   :  { %v536_v43 = vadd.f32 %v535_v42, %v534_v22 }
 0x353   :  { %v543_v6 = vadd.f32 %v542_v40, %v541_v41 }
 0x354   :  { %v557_v10 = vsel %vm1113_vm1, %v536_v43, %v556_v50 }
 0x355   :  { %v558_v52 = vsel %vm1114_vm10, %v543_v6, %v557_v10 }
 0x356   :  { %560 = vst.msk [vmem:[#allocation7] sm:$0xff] %vm64_vm0, %v558_v52 }
 0x357   :  { %581 = vsyncadd [#allocation4], 96  ;;  %s584_s28 = sshll.u32 %s1101_s3, 4  ;;  %s806_s29 = smov [#allocation7]   ;;  %s585_s28 = int_to_ptr.hbm [resolvable:$true] %s584_s28 }
 0x358   :  { %s582_s30 = sshll.u32 %s806_s29, 4  ;;  %s807_s5 = smov 32   ;;  %s583_s30 = int_to_ptr.vmem [resolvable:$true] %s582_s30 }
 0x359   :  { %s808_s6 = smov 2  }
 0x35a   :  { %590 = dma.vmem_to_hbm [thread:$0]  %s583_s30, 32, %s585_s28, [#allocation4], %s807_s5, %s807_s5, %s808_s6  }
 0x35b   :  { %594 = vsyncadd [#allocation9], 96  ;;  %s597_s9 = sshll.u32 %s1102_s4, 4  ;;  %s809_s10 = smov [#allocation8]   ;;  %s598_s9 = int_to_ptr.hbm [resolvable:$true] %s597_s9 }
 0x35c   :  { %s595_s11 = sshll.u32 %s809_s10, 4  ;;  %s596_s11 = int_to_ptr.vmem [resolvable:$true] %s595_s11 }
 0x35d   :  { %603 = dma.vmem_to_hbm [thread:$0]  %s596_s11, 32, %s598_s9, [#allocation9], %s807_s5, %s807_s5, %s808_s6  }
 0x35e   :  { %797 = dma.done.wait [#allocation4], 128  }
 0x35f   :  { %798 = vsyncadd [#allocation4], 4294967168 }
 0x360   :  { %799 = dma.done.wait [#allocation9], 128  }
 0x361   :  { %800 = vsyncadd [#allocation9], 4294967168 }
 0x362   :  { %612 = vsyncpa [#allocation3], 1 }
 0x363   :  { %613 = vsyncpa [#allocation6], 1 }
 0x364   :  { %614 = vsyncpa [#allocation4], 1 }
 0x365   :  { %615 = vsyncpa [#allocation9], 1 }

</bundles_post_ra>
